<compile_context>
chip_gen: v7x
topology: tpu7x:2x2x1
jax: 0.10.0
libtpu: 0.0.40
codegen_flags: <defaults>
</compile_context>

<pallas_src>
import functools

import jax
import jax.numpy as jnp
from jax import lax
from jax.experimental import pallas as pl
from jax.experimental.pallas import tpu as pltpu


# ---------------------------------------------------------------------------
# Fused kernel: power iteration + sigma + single im2col conv matmul.
#   w2d_ref : (Cout, width)  f32   -- PyTorch w_bar.view(Cout, -1)
#   u0_ref  : (1, Cout) f32,  v0_ref : (1, width) f32
#   p_ref   : (width, N)     bf16  -- im2col patches, N = Bblk*Ho*Wo (lanes)
#   b_ref   : (Cout, 1)      f32
#   y_ref   : (Cout, N), u_ref : (1, Cout), v_ref : (1, width)
# ---------------------------------------------------------------------------
def sn_conv_kernel(w2d_ref, u0_ref, v0_ref, p_ref, b_ref,
                   y_ref, u_ref, v_ref, *, power_iterations, eps):
    # ----- spectral norm: power iteration + sigma (f32, latency-bound) -----
    w = w2d_ref[...]                          # (Cout, width)
    u = u0_ref[...]                           # (1, Cout)
    v = v0_ref[...]                           # (1, width)
    wu = u                                    # placeholder; power_iterations >= 1
    # NOTE: x * rsqrt(sum(x^2) + eps^2) instead of x / (||x|| + eps): EUP
    # rsqrt shortens the serial normalize chain; deviation from PyTorch is
    # O(eps) for any non-degenerate norm.
    for _ in range(power_iterations):         # static, tiny trip count
        wv = jnp.dot(u, w, preferred_element_type=jnp.float32)   # (1,width) = (W^T u)^T
        v = wv * lax.rsqrt(jnp.sum(wv * wv, axis=1, keepdims=True) + eps * eps)
        # (W v)^T without materializing w.T: contract the last dims.
        wu = lax.dot_general(v, w, (((1,), (1,)), ((), ())),
                             preferred_element_type=jnp.float32)  # (1, Cout)
        u = wu * lax.rsqrt(jnp.sum(wu * wu, axis=1, keepdims=True) + eps * eps)
    # sigma = u . (W v) with the updated u, v; wu already holds (W v)^T.
    sigma = jnp.sum(u * wu, axis=1, keepdims=True)                # (1, 1)
    inv_sigma = pl.reciprocal(sigma, approx=True)                 # EUP slot
    u_ref[...] = u
    v_ref[...] = v

    # ----- conv: single im2col MXU matmul; 1/sigma + bias in the epilogue --
    w_bf = w.astype(jnp.bfloat16)                                 # cast once
    acc = jnp.dot(w_bf, p_ref[...], preferred_element_type=jnp.float32)  # (Cout, N)
    y_ref[...] = (acc * inv_sigma + b_ref[...]).astype(y_ref.dtype)


def _pick_batch_block(batch, max_block):
    """Largest divisor of `batch` <= max_block, keeping >= 2 grid steps when
    batch >= 2 (so both v7x TensorCores get work under 'parallel')."""
    cap = max(1, min(max_block, batch // 2 if batch >= 2 else batch))
    for c in range(cap, 0, -1):
        if batch % c == 0:
            return c
    return 1


# ---------------------------------------------------------------------------
# Wrapper: SpectralNorm(Conv2d) forward.  Returns (y_nchw, u_new, v_new).
# ---------------------------------------------------------------------------
def spectral_norm_conv_forward(x_nchw, w_bar, bias, u, v, *,
                               power_iterations=1, eps=1e-12, padding=1,
                               max_batch_block=8):
    assert power_iterations >= 1
    B, Cin, H, W = x_nchw.shape
    Cout, Cin_w, KH, KW = w_bar.shape
    assert Cin_w == Cin
    width = Cin * KH * KW
    Hp, Wp = H + 2 * padding, W + 2 * padding
    Ho, Wo = Hp - KH + 1, Wp - KW + 1
    # TODO(synk): stride=1 / dilation=1 only; the im2col patch matrix costs
    # KH*KW x the activation HBM footprint -- for large images tile Ho with a
    # (KH-1) halo inside the kernel instead (budget against v7x's 64 MiB VMEM).

    Bblk = _pick_batch_block(B, max_batch_block)
    nblk = B // Bblk
    N = Bblk * Ho * Wo

    # Layout plumbing in the wrapper (XLA), all tiny:
    #   * im2col patches (nblk, width, Bblk*Ho*Wo) in bf16, feature index
    #     cin*(KH*KW) + kh*KW + kw  == the column order of w_bar.view(Cout,-1)
    #   * lane axis = Bblk*Ho*Wo -> dense vregs and unmasked stores in-kernel.
    xp = jnp.pad(x_nchw, ((0, 0), (0, 0), (padding, padding), (padding, padding)))
    cols = [xp[:, :, kh:kh + Ho, kw:kw + Wo]
            for kh in range(KH) for kw in range(KW)]          # each (B,Cin,Ho,Wo)
    patches = jnp.stack(cols, axis=2).reshape(B, width, Ho * Wo)
    patches = patches.reshape(nblk, Bblk, width, Ho * Wo)
    patches = jnp.transpose(patches, (0, 2, 1, 3)).reshape(nblk, width, N)
    patches = patches.astype(jnp.bfloat16)

    w2d = w_bar.reshape(Cout, width)

    kern = functools.partial(sn_conv_kernel,
                             power_iterations=power_iterations, eps=eps)
    y_flat, u_new, v_new = pl.pallas_call(
        kern,
        grid=(nblk,),
        in_specs=[
            pl.BlockSpec((Cout, width), lambda g: (0, 0)),
            pl.BlockSpec((1, Cout), lambda g: (0, 0)),
            pl.BlockSpec((1, width), lambda g: (0, 0)),
            pl.BlockSpec((None, width, N), lambda g: (g, 0, 0)),
            pl.BlockSpec((Cout, 1), lambda g: (0, 0)),
        ],
        out_specs=(
            pl.BlockSpec((None, Cout, N), lambda g: (g, 0, 0)),
            pl.BlockSpec((None, 1, Cout), lambda g: (g, 0, 0)),
            pl.BlockSpec((None, 1, width), lambda g: (g, 0, 0)),
        ),
        out_shape=(
            jax.ShapeDtypeStruct((nblk, Cout, N), x_nchw.dtype),
            jax.ShapeDtypeStruct((nblk, 1, Cout), jnp.float32),
            jax.ShapeDtypeStruct((nblk, 1, width), jnp.float32),
        ),
        compiler_params=pltpu.CompilerParams(dimension_semantics=("parallel",)),
    )(w2d, u.reshape(1, Cout), v.reshape(1, width), patches,
      bias.reshape(Cout, 1))

    # (nblk, Cout, Bblk*Ho*Wo) -> (B, Cout, Ho, Wo).  With Bblk == 1 the
    # transpose is trivial and folded away by XLA.
    y = y_flat.reshape(nblk, Cout, Bblk, Ho, Wo)
    y = jnp.transpose(y, (0, 2, 1, 3, 4)).reshape(B, Cout, Ho, Wo)
    # u/v are identical across grid steps (same weights); take block 0.
    return y, u_new[0, 0], v_new[0, 0]


# ---------------------------------------------------------------------------
# Pure-JAX reference (mirrors the PyTorch math) for correctness checking.
# ---------------------------------------------------------------------------
def reference_forward(x, w_bar, bias, u0, v0, *, power_iterations=1, eps=1e-12):
    h = w_bar.shape[0]
    w2d = w_bar.reshape(h, -1)
    u, v = u0, v0
    for _ in range(power_iterations):
        v = w2d.T @ u
        v = v / (jnp.linalg.norm(v) + eps)
        u = w2d @ v
        u = u / (jnp.linalg.norm(u) + eps)
    sigma = u @ (w2d @ v)
    w_sn = (w2d / sigma).reshape(w_bar.shape)
    y = lax.conv_general_dilated(
        x, w_sn, window_strides=(1, 1), padding=((1, 1), (1, 1)),
        dimension_numbers=('NCHW', 'OIHW', 'NCHW'))
    return y + bias[None, :, None, None], u, v


if __name__ == "__main__":
    key = jax.random.PRNGKey(0)
    k_x, k_w, k_b, k_u, k_v = jax.random.split(key, 5)

    # SpectralNorm(nn.Conv2d(4, 8, 3, padding=1)) with synthetic params
    B, Cin, Hs, Ws = 2, 4, 16, 16
    Cout, KH, KW = 8, 3, 3
    height, width = Cout, Cin * KH * KW

    x = jax.random.normal(k_x, (B, Cin, Hs, Ws), dtype=jnp.float32)
    w_bar = 0.1 * jax.random.normal(k_w, (Cout, Cin, KH, KW), dtype=jnp.float32)
    bias = 0.05 * jax.random.normal(k_b, (Cout,), dtype=jnp.float32)

    # u, v buffers: normal(0, 1) then l2-normalized, as in makeParams()
    u = jax.random.normal(k_u, (height,), dtype=jnp.float32)
    v = jax.random.normal(k_v, (width,), dtype=jnp.float32)
    u = u / (jnp.linalg.norm(u) + 1e-12)
    v = v / (jnp.linalg.norm(v) + 1e-12)

    y, u_new, v_new = spectral_norm_conv_forward(x, w_bar, bias, u, v,
                                                 power_iterations=1)
    y = jax.block_until_ready(y)

    y_want, u_want, v_want = reference_forward(x, w_bar, bias, u, v,
                                               power_iterations=1)
    assert y.shape == (B, Cout, Hs, Ws), y.shape
    # power-iteration state is f32 (rsqrt-based); matches /(norm+eps) to ~O(eps)
    assert jnp.allclose(u_new, u_want, rtol=1e-3, atol=1e-3), \
        float(jnp.max(jnp.abs(u_new - u_want)))
    assert jnp.allclose(v_new, v_want, rtol=1e-3, atol=1e-3), \
        float(jnp.max(jnp.abs(v_new - v_want)))
    # conv uses bf16 MXU operands (f32 accumulation) + approx 1/sigma
    assert jnp.allclose(y, y_want, rtol=2e-2, atol=2e-2), \
        float(jnp.max(jnp.abs(y - y_want)))

    print("KERNEL_OK")
</pallas_src>

<mosaic_0001>
module attributes {stable_mosaic.version = 11 : i64} {
  func.func @sn_conv_kernel(%arg0: i32, %arg1: memref<8x36xf32, #tpu.memory_space<vmem>>, %arg2: memref<1x8xf32, #tpu.memory_space<vmem>>, %arg3: memref<1x36xf32, #tpu.memory_space<vmem>>, %arg4: memref<1x36x256xbf16, #tpu.memory_space<vmem>>, %arg5: memref<8x1xf32, #tpu.memory_space<vmem>>, %arg6: memref<1x8x256xf32, #tpu.memory_space<vmem>>, %arg7: memref<1x1x8xf32, #tpu.memory_space<vmem>>, %arg8: memref<1x1x36xf32, #tpu.memory_space<vmem>>) attributes {dimension_semantics = [#tpu.dimension_semantics<parallel>], iteration_bounds = array<i64: 2>, scalar_prefetch = 0 : i64, scratch_operands = 0 : i64, tpu.core_type = #tpu.core_type<tc>, window_params = [{pipeline_mode = #tpu.pipeline_mode<synchronous>, transform_indices = @transform_0, window_bounds = array<i64: 8, 36>}, {pipeline_mode = #tpu.pipeline_mode<synchronous>, transform_indices = @transform_1, window_bounds = array<i64: 1, 8>}, {pipeline_mode = #tpu.pipeline_mode<synchronous>, transform_indices = @transform_2, window_bounds = array<i64: 1, 36>}, {transform_indices = @transform_3, window_bounds = array<i64: 1, 36, 256>}, {pipeline_mode = #tpu.pipeline_mode<synchronous>, transform_indices = @transform_4, window_bounds = array<i64: 8, 1>}, {transform_indices = @transform_5, window_bounds = array<i64: 1, 8, 256>}, {transform_indices = @transform_6, window_bounds = array<i64: 1, 1, 8>}, {transform_indices = @transform_7, window_bounds = array<i64: 1, 1, 36>}]} {
    %c0 = arith.constant 0 : index
    %c0_0 = arith.constant 0 : index
    %0 = vector.load %arg1[%c0, %c0_0] : memref<8x36xf32, #tpu.memory_space<vmem>>, vector<8x36xf32>
    %c0_1 = arith.constant 0 : index
    %c0_2 = arith.constant 0 : index
    %1 = vector.load %arg2[%c0_1, %c0_2] : memref<1x8xf32, #tpu.memory_space<vmem>>, vector<1x8xf32>
    %cst = arith.constant dense<0.000000e+00> : vector<1x36xf32>
    %2 = tpu.matmul %1, %0, %cst {dimension_numbers = #tpu.dot_dimension_numbers<[1], [0], [0], [1], [0, 0, 1, 1], [], []>} : vector<1x8xf32>, vector<8x36xf32>, vector<1x36xf32> -> vector<1x36xf32>
    %3 = arith.mulf %2, %2 : vector<1x36xf32>
    %cst_3 = arith.constant dense<0.000000e+00> : vector<1xf32>
    %4 = vector.multi_reduction <add>, %3, %cst_3 [1] : vector<1x36xf32> to vector<1xf32>
    %5 = vector.shape_cast %4 : vector<1xf32> to vector<1x1xf32>
    %cst_4 = arith.constant 1.000000e-24 : f32
    %6 = vector.broadcast %cst_4 : f32 to vector<1x1xf32>
    %7 = arith.addf %5, %6 : vector<1x1xf32>
    %8 = math.rsqrt %7 : vector<1x1xf32>
    %9 = vector.broadcast %8 : vector<1x1xf32> to vector<1x36xf32>
    %10 = arith.mulf %2, %9 : vector<1x36xf32>
    %cst_5 = arith.constant dense<0.000000e+00> : vector<1x8xf32>
    %11 = tpu.matmul %10, %0, %cst_5 {dimension_numbers = #tpu.dot_dimension_numbers<[1], [1], [0], [0], [0, 0, 1, 0], [], []>} : vector<1x36xf32>, vector<8x36xf32>, vector<1x8xf32> -> vector<1x8xf32>
    %12 = arith.mulf %11, %11 : vector<1x8xf32>
    %cst_6 = arith.constant dense<0.000000e+00> : vector<1xf32>
    %13 = vector.multi_reduction <add>, %12, %cst_6 [1] : vector<1x8xf32> to vector<1xf32>
    %14 = vector.shape_cast %13 : vector<1xf32> to vector<1x1xf32>
    %cst_7 = arith.constant 1.000000e-24 : f32
    %15 = vector.broadcast %cst_7 : f32 to vector<1x1xf32>
    %16 = arith.addf %14, %15 : vector<1x1xf32>
    %17 = math.rsqrt %16 : vector<1x1xf32>
    %18 = vector.broadcast %17 : vector<1x1xf32> to vector<1x8xf32>
    %19 = arith.mulf %11, %18 : vector<1x8xf32>
    %20 = arith.mulf %19, %11 : vector<1x8xf32>
    %cst_8 = arith.constant dense<0.000000e+00> : vector<1xf32>
    %21 = vector.multi_reduction <add>, %20, %cst_8 [1] : vector<1x8xf32> to vector<1xf32>
    %22 = vector.shape_cast %21 : vector<1xf32> to vector<1x1xf32>
    %23 = tpu.reciprocal %22 {approx = true} : vector<1x1xf32> -> vector<1x1xf32>
    %c0_9 = arith.constant 0 : index
    %c0_10 = arith.constant 0 : index
    %c0_11 = arith.constant 0 : index
    %24 = vector.load %arg7[%c0_9, %c0_10, %c0_11] : memref<1x1x8xf32, #tpu.memory_space<vmem>>, vector<1x1x8xf32>
    %25 = vector.shape_cast %24 : vector<1x1x8xf32> to vector<1x8xf32>
    %26 = vector.shape_cast %19 : vector<1x8xf32> to vector<1x1x8xf32>
    tpu.vector_store %arg7[%c0_9, %c0_10, %c0_11], %26 {strides = array<i32>} : memref<1x1x8xf32, #tpu.memory_space<vmem>>, vector<1x1x8xf32>,
    %c0_12 = arith.constant 0 : index
    %c0_13 = arith.constant 0 : index
    %c0_14 = arith.constant 0 : index
    %27 = vector.load %arg8[%c0_12, %c0_13, %c0_14] : memref<1x1x36xf32, #tpu.memory_space<vmem>>, vector<1x1x36xf32>
    %28 = vector.shape_cast %27 : vector<1x1x36xf32> to vector<1x36xf32>
    %29 = vector.shape_cast %10 : vector<1x36xf32> to vector<1x1x36xf32>
    tpu.vector_store %arg8[%c0_12, %c0_13, %c0_14], %29 {strides = array<i32>} : memref<1x1x36xf32, #tpu.memory_space<vmem>>, vector<1x1x36xf32>,
    %30 = arith.truncf %0 : vector<8x36xf32> to vector<8x36xbf16>
    %c0_15 = arith.constant 0 : index
    %c0_16 = arith.constant 0 : index
    %c0_17 = arith.constant 0 : index
    %31 = vector.load %arg4[%c0_15, %c0_16, %c0_17] : memref<1x36x256xbf16, #tpu.memory_space<vmem>>, vector<1x36x256xbf16>
    %32 = vector.shape_cast %31 : vector<1x36x256xbf16> to vector<36x256xbf16>
    %cst_18 = arith.constant dense<0.000000e+00> : vector<8x256xf32>
    %33 = tpu.matmul %30, %32, %cst_18 {dimension_numbers = #tpu.dot_dimension_numbers<[1], [0], [0], [1], [0, 0, 1, 1], [], []>} : vector<8x36xbf16>, vector<36x256xbf16>, vector<8x256xf32> -> vector<8x256xf32>
    %34 = vector.broadcast %23 : vector<1x1xf32> to vector<8x256xf32>
    %35 = arith.mulf %33, %34 : vector<8x256xf32>
    %c0_19 = arith.constant 0 : index
    %c0_20 = arith.constant 0 : index
    %36 = vector.load %arg5[%c0_19, %c0_20] : memref<8x1xf32, #tpu.memory_space<vmem>>, vector<8x1xf32>
    %37 = vector.broadcast %36 : vector<8x1xf32> to vector<8x256xf32>
    %38 = arith.addf %35, %37 : vector<8x256xf32>
    %c0_21 = arith.constant 0 : index
    %c0_22 = arith.constant 0 : index
    %c0_23 = arith.constant 0 : index
    %39 = vector.load %arg6[%c0_21, %c0_22, %c0_23] : memref<1x8x256xf32, #tpu.memory_space<vmem>>, vector<1x8x256xf32>
    %40 = vector.shape_cast %39 : vector<1x8x256xf32> to vector<8x256xf32>
    %41 = vector.shape_cast %38 : vector<8x256xf32> to vector<1x8x256xf32>
    tpu.vector_store %arg6[%c0_21, %c0_22, %c0_23], %41 {strides = array<i32>} : memref<1x8x256xf32, #tpu.memory_space<vmem>>, vector<1x8x256xf32>,
    return
  }
  func.func @transform_0(%arg0: i32) -> (i32, i32) {
    %c0_i32 = arith.constant 0 : i32
    %c0_i32_0 = arith.constant 0 : i32
    %c0_i32_1 = arith.constant 0 : i32
    return %c0_i32, %c0_i32_0 : i32, i32
  }
  func.func @transform_1(%arg0: i32) -> (i32, i32) {
    %c0_i32 = arith.constant 0 : i32
    %c0_i32_0 = arith.constant 0 : i32
    %c0_i32_1 = arith.constant 0 : i32
    return %c0_i32, %c0_i32_0 : i32, i32
  }
  func.func @transform_2(%arg0: i32) -> (i32, i32) {
    %c0_i32 = arith.constant 0 : i32
    %c0_i32_0 = arith.constant 0 : i32
    %c0_i32_1 = arith.constant 0 : i32
    return %c0_i32, %c0_i32_0 : i32, i32
  }
  func.func @transform_3(%arg0: i32) -> (i32, i32, i32) {
    %c0_i32 = arith.constant 0 : i32
    %c0_i32_0 = arith.constant 0 : i32
    %c0_i32_1 = arith.constant 0 : i32
    return %arg0, %c0_i32, %c0_i32_0 : i32, i32, i32
  }
  func.func @transform_4(%arg0: i32) -> (i32, i32) {
    %c0_i32 = arith.constant 0 : i32
    %c0_i32_0 = arith.constant 0 : i32
    %c0_i32_1 = arith.constant 0 : i32
    return %c0_i32, %c0_i32_0 : i32, i32
  }
  func.func @transform_5(%arg0: i32) -> (i32, i32, i32) {
    %c0_i32 = arith.constant 0 : i32
    %c0_i32_0 = arith.constant 0 : i32
    %c0_i32_1 = arith.constant 0 : i32
    return %arg0, %c0_i32, %c0_i32_0 : i32, i32, i32
  }
  func.func @transform_6(%arg0: i32) -> (i32, i32, i32) {
    %c0_i32 = arith.constant 0 : i32
    %c0_i32_0 = arith.constant 0 : i32
    %c0_i32_1 = arith.constant 0 : i32
    return %arg0, %c0_i32, %c0_i32_0 : i32, i32, i32
  }
  func.func @transform_7(%arg0: i32) -> (i32, i32, i32) {
    %c0_i32 = arith.constant 0 : i32
    %c0_i32_0 = arith.constant 0 : i32
    %c0_i32_1 = arith.constant 0 : i32
    return %arg0, %c0_i32, %c0_i32_0 : i32, i32, i32
  }
}

</mosaic_0001>

<bundles_post_ra>
// kernel: tpu_custom_call.1
= control target key start
LH: loop header
LB: loop body
LE: loop exit
PB: predicated region body
PF: predicated region fallthrough
CT: control target
= control target key end

     0   :  { %13 = vsyncpa [#allocation3], 0  ;;  %s1193_s0 = inlined_call_operand.vmem [shape: f32[8,36], index: 0, kind: input, shape index: {}]   ;;  %s1194_s1 = inlined_call_operand.vmem [shape: f32[1,8], index: 1, kind: input, shape index: {}]   ;;  %s1195_s2 = inlined_call_operand.vmem [shape: f32[1,36], index: 2, kind: input, shape index: {}]   ;;  %s1196_s3 = inlined_call_operand.vmem [shape: bf16[2,36,256], index: 3, kind: input, shape index: {}]   ;;  %s1197_s4 = inlined_call_operand.vmem [shape: f32[8,1], index: 4, kind: input, shape index: {}]   ;;  %s1198_s5 = inlined_call_operand.hbm [shape: f32[2,8,256], index: 5, kind: output, shape index: {0}]   ;;  %s1199_s6 = inlined_call_operand.hbm [shape: f32[2,1,8], index: 6, kind: output, shape index: {1}]   ;;  %s1200_s7 = inlined_call_operand.hbm [shape: f32[2,1,36], index: 7, kind: output, shape index: {2}]  }
   0x1   :  { %15 = vsyncpa [#allocation3 + $0x1], 0 }
   0x2   :  { %16 = vsyncpa [#allocation5], 0 }
   0x3   :  { %18 = vsyncpa [#allocation5 + $0x1], 0  ;;  %s1007_s2 = smov 0   ;;  %s1009_s24 = smov 0  }
   0x4   :  { %s1011_s25 = smov 0   ;;  %s1013_s26 = smov 0  }
   0x5 LB: > { %s1028_s27 = sadd.s32 4294967295, %s959_s26   ;;  %s729_s28 = sadd.s32 4294967294, %s959_s26   ;;  %s959_s26 = sphi %s1013_s26, %s1206_s26   ;;  %s955_s25 = sphi %s1011_s25, %s1205_s25   ;;  %s951_s24 = sphi %s1009_s24, %s1204_s24   ;;  %s947_s2 = sphi %s1007_s2, %s1203_s2  }
   0x6   : > { %s1032_s29 = sadd.s32 1, %s959_s26   ;;  %s141_s30 = sadd.s32 1, %s955_s25 }
   0x7   : > { %s138_s8 = ssub.s32 %s959_s26, %s1032_s29  ;;  %p151_p0 = scmp.ne.s32.totalorder %s955_s25, %s951_s24 }
   0x8   : > { %p139_p1 = scmp.eq.s32.totalorder %s138_s8, 0  ;;  %p152_p2 = scmp.eq.s32.totalorder %s1028_s27, 1 }
   0x9   : > { %p157_p3 = scmp.ne.s32.totalorder %s951_s24, %s947_s2  ;;  %p158_p4 = scmp.eq.s32.totalorder %s729_s28, 1 }
   0xa   : > { %s1045_s9 = scalar_select %p139_p1, %s955_s25, %s141_s30  }
   0xb   : > { %p1047_p5 = por %p152_p2, %p151_p0  ;;  %p1051_p6 = por %p158_p4, %p157_p3 }
   0xc   : > { %p732_p7 = scmp.ge.s32.totalorder %s959_s26, 1  ;;  %p248_p8 = scmp.lt.s32.totalorder %s959_s26, 3 }
   0xe   : > { %p249_p9 = pnand %p732_p7, %p248_p8 }
   0xf   : > { %v294_v0 = vld [vmem:[%s1193_s0] sm:$0xff] (!%p249_p9)  ;;  %vm296_vm0 = vcmask (!%p249_p9), 64512   ;;  %v961_v2 = vmov (!%p249_p9), 0.0   ;;  %vm962_vm1 = vmmov (!%p249_p9), 0   ;;  %vm371_vm2 = vcmask (!%p249_p9), 286720   ;;  %s1065_s16 = sand.u32 (!%p249_p9), 1, %s951_s24  }
  0x10   : > { %252 = sbr.rel (%p249_p9) target bundleno = 938 (0x3aa), region = 40  ;;  %v295_v1 = vld [vmem:[%s1194_s1] sm:$0x1] (!%p249_p9)  ;;  %758 = vmatprep.subr.mxu1 (!%p249_p9), %v961_v2  ;;  %760 = vmatprep.mubr.msk.f32.mxu1 (!%p249_p9), %vm962_vm1, %v961_v2  ;;  %vm378_vm3 = vcmask (!%p249_p9), 293888   ;;  %s287_s17 = scalar_lea.vmem (!%p249_p9), [#allocation6], %s1065_s16  ;;  %v963_v11 = vmov (!%p249_p9), 0   ;;  %v470_v20 = vpack.c.bf16 (!%p249_p9), %v294_v0, %v294_v0 }
  0x11   : > { %759 = vmatpush3.msra.mxu1 (!%p249_p9), %v294_v0  ;;  %p288_p10 = scmp.lt.s32.totalorder (!%p249_p9), %s1028_s27, 1  ;;  %543 = vmatprep.mubr.bf16.mxu0 (!%p249_p9), %v963_v11  ;;  %vm504_vm4 = vcmask (!%p249_p9), 1041408   ;;  %vm456_vm5 = vcmask (!%p249_p9), 57344   ;;  %s281_s23 = scalar_lea.vmem (!%p249_p9), [#allocation4], %s1065_s16  ;;  %v558_v31 = vld [vmem:[%s1197_s4] sm:$0xff] (!%p249_p9) }
  0x12   : > { %761 = vmatmul.mubr.msk.f32.vlgmr.msra.gmra.mrb[0].mxu1 (!%p249_p9), %vm296_vm0, %v295_v1  ;;  %763 = vmatprep.subr.mxu1 (!%p249_p9), %v961_v2  ;;  %s573_s12 = sand.u32 (!%p249_p9), 1, %s1028_s27   ;;  %s749_s13 = sshll.u32 (!%p249_p9), %s1028_s27, 4 }
  0x13   : > { %765 = vmatprep.mubr.msk.f32.mxu1 (!%p249_p9), %vm962_vm1, %v961_v2  ;;  %821 = vset.pattern.permute.xlu1 (!%p249_p9), %v963_v11  ;;  %s1094_s20 = scalar_lea.sflag (!%p249_p9), [#allocation5], %s573_s12 }
  0x14   : > { %822 = vset.pattern.permute.xlu0 (!%p249_p9), %v963_v11 }
  0x17   : > { %s289_s18 = scalar_select %p288_p10, %s1028_s27, 1 }
  0x18   : > { %764 = vmatpush3.xpose.msk.msra.mxu1 %vm378_vm3, %v294_v0 }
  0x19   : > { %s768_s19 = smul.u32 40, %s289_s18  ;;  %s1092_s18 = scalar_lea.hbm %s1199_s6, %s749_s13 }
  0x1b   : > { %s292_s22 = scalar_lea.vmem %s1196_s3, %s768_s19  ;;  %s604_s19 = sshll.u32 %s281_s23, 4  ;;  %s605_s19 = int_to_ptr.vmem [resolvable:$true] %s604_s19 }
  0x1c   : > { %v823_v12 = vld [vmem:[%s292_s22 + $0x4] ss:$8 sps:$4 sm:$0xff]   ;;  %v825_v13 = vld [vmem:[%s292_s22] ss:$8 sps:$4 sm:$0xff]   ;;  %v826_v14 = vld [vmem:[%s292_s22 + $0x14] ss:$8 sps:$4 sm:$0xff]  }
  0x1d   : > { %511 = vmatprep.subr.bf16.mxu0 %v823_v12  ;;  %v475_v15 = vld [vmem:[%s292_s22 + $0x20] sm:$0x33]  ;;  %v828_v16 = vld [vmem:[%s292_s22 + $0x10] ss:$8 sps:$4 sm:$0xff]   ;;  %s837_s21 = scalar_lea.vmem %s605_s19, 16  ;;  %s964_s22 = smov [#allocation4]  }
  0x1e   : > { %512 = vmatpush1.bf16.msra.mxu0 %v825_v13  ;;  %v743_v17 = vcombine.high %v475_v15, %v475_v15  ;;  %v742_v18 = vcombine.low %v475_v15, %v475_v15  ;;  %p838_p11 = scmp.ne.s32.totalorder %s605_s19, %s837_s21  ;;  %s841_s30 = sshll.u32 %s964_s22, 4  ;;  %s842_s30 = int_to_ptr.vmem [resolvable:$false] %s841_s30 }
  0x1f   : > { %513 = vmatprep.subr.bf16.mxu0 %v826_v14  ;;  %s843_s8 = scalar_lea.vmem %s842_s30, 32  ;;  %p844_p0 = scmp.lt.s32.totalorder %s605_s19, %s842_s30 }
  0x20   : > { %v506_v19 = vsel %vm504_vm4, %v742_v18, 0  ;;  %p839_p12 = pnand %p838_p11, %p1047_p5  ;;  %p845_p1 = scmp.lt.s32.totalorder %s843_s8, %s837_s21 }
  0x22   : > { %514 = vmatpush1.bf16.msra.mxu0 %v828_v16  ;;  %p840_p13 = pneg %p839_p12  ;;  %p846_p2 = por %p845_p1, %p844_p0 }
  0x23   : > { %744 = vmatprep.subr.msk.bf16.mxu0 %vm504_vm4, %v743_v17 }
  0x24   : > { %p847_p3 = pnand %p846_p2, %p840_p13 }
  0x26   : > { %516 = vmatpush1.bf16.msra.mxu0 %v506_v19 }
  0x29   : > { %745 = vmatmul.mubr.msk.bf16.vlgmr.msra.gmra.mrb[0].mxu0 %vm378_vm3, %v470_v20 }
  0xe5   : > { %v366_v3 = vpop.f32.mrb[0].mxu1 }
  0xe6   : > { %v762_v4 = vpop.f32.mrb[1].mxu1  ;;  %v370_v5 = vmul.f32 %v366_v3, %v366_v3 }
  0xe8   : > { %v372_v6 = vsel %vm371_vm2, %v370_v5, 0.0 }
  0xe9   : > { %373 = vadd.xlane.f32.xlu0 %v372_v6 }
  0xfc   : > { %v1081_v32 = vpop.f32.mrb[0].mxu0 }
  0xfd   : > { %v1083_v33 = vpop.f32.mrb[1].mxu0 }
  0xfe   : > { %v549_v34 = vpop.f32.mrb[2].mxu0 }
  0xff   : > { %v550_v35 = vpop.f32.mrb[3].mxu0 }
 0x176   : > { %v374_v7 = vpop.xlane.xlu0 %373 }
 0x177   : > { %v375_v8 = vadd.f32 1e-24, %v374_v7 }
 0x179   : > { %831 = vrsqrt.f32 %v375_v8 }
 0x183   : > { %v832_v9 = vpop.eup %831 }
 0x184   : > { %v377_v10 = vmul.f32 %v832_v9, %v366_v3 }
 0x186   : > { %766 = vmatmul.mubr.msk.f32.vlgmr.msra.gmra.mrb[2].mxu1 %vm378_vm3, %v377_v10  ;;  %469 = vst.msk [vmem:[%s287_s17] sm:$0x1] %vm371_vm2, %v377_v10 }
 0x259   : > { %v451_v21 = vpop.f32.mrb[2].mxu1 }
 0x25a   : > { %v767_v22 = vpop.f32.mrb[3].mxu1  ;;  %v455_v23 = vmul.f32 %v451_v21, %v451_v21 }
 0x25c   : > { %v457_v24 = vsel %vm456_vm5, %v455_v23, 0.0 }
 0x25d   : > { %458 = vadd.xlane.f32.xlu0 %v457_v24 }
 0x2ea   : > { %v459_v25 = vpop.xlane.xlu0 %458 }
 0x2eb   : > { %v460_v26 = vadd.f32 1e-24, %v459_v25 }
 0x2ed   : > { %833 = vrsqrt.f32 %v460_v26 }
 0x2f7   : > { %v834_v27 = vpop.eup %833 }
 0x2f8   : > { %v462_v28 = vmul.f32 %v834_v27, %v451_v21 }
 0x2fa   : > { %v463_v29 = vmul.f32 %v462_v28, %v451_v21  ;;  %468 = vst.msk [vmem:[%s281_s23] sm:$0x1] %vm456_vm5, %v462_v28 }
 0x2fc   : > { %v464_v30 = vsel %vm456_vm5, %v463_v29, 0.0 }
 0x2fd   : > { %465 = vadd.xlane.f32.xlu1 %v464_v30 }
 0x30e   : > { %561 = vperm.xlu1 %821, %v558_v31  }
 0x30f   : > { %850 = shalt.err (!%p847_p3)
}
 0x310   : > { %s851_s23 = scalar_lea.hbm %s1092_s18, 16  ;;  %s855_s15 = scalar_lea.hbm %s1199_s6, 32 }
 0x311   : > { %p852_p4 = scmp.ne.s32.totalorder %s1092_s18, %s851_s23  ;;  %p856_p9 = scmp.lt.u32.totalorder %s1092_s18, %s1199_s6 }
 0x312   : > { %p857_p10 = scmp.lt.u32.totalorder %s855_s15, %s851_s23  ;;  %p859_p12 = scmp.lt.u32.totalorder %s851_s23, %s1092_s18 }
 0x313   : > { %p853_p7 = pnand %p852_p4, %p1047_p5 }
 0x314   : > { %p858_p11 = por %p857_p10, %p856_p9 }
 0x315   : > { %p854_p8 = pneg %p853_p7 }
 0x316   : > { %p860_p13 = por %p859_p12, %p858_p11 }
 0x318   : > { %p861_p0 = pnand %p860_p13, %p854_p8 }
 0x31a   : > { %864 = shalt.err (!%p861_p0)
}
 0x31b   : > { %770 = dma.vmem_to_hbm [thread:$0]  (%p1047_p5), %s605_s19, 16, %s1092_s18, %s1094_s20  }
 0x31c   : > { %s1119_s12 = scalar_lea.hbm %s1200_s7, %s749_s13  ;;  %s617_s14 = sshll.u32 %s287_s17, 4  ;;  %s618_s14 = int_to_ptr.vmem [resolvable:$true] %s617_s14 }
 0x31d   : > { %s865_s23 = scalar_lea.vmem %s618_s14, 16  ;;  %s965_s15 = smov [#allocation6]  }
 0x31e   : > { %p866_p1 = scmp.ne.s32.totalorder %s618_s14, %s865_s23  ;;  %s869_s22 = sshll.u32 %s965_s15, 4  ;;  %s870_s22 = int_to_ptr.vmem [resolvable:$false] %s869_s22 }
 0x31f   : > { %s871_s30 = scalar_lea.vmem %s870_s22, 32  ;;  %p872_p4 = scmp.lt.s32.totalorder %s618_s14, %s870_s22 }
 0x320   : > { %p867_p2 = pnand %p866_p1, %p1047_p5  ;;  %p873_p7 = scmp.lt.s32.totalorder %s871_s30, %s865_s23 }
 0x322   : > { %p868_p3 = pneg %p867_p2  ;;  %p874_p8 = por %p873_p7, %p872_p4 }
 0x324   : > { %p875_p9 = pnand %p874_p8, %p868_p3 }
 0x326   : > { %878 = shalt.err (!%p875_p9)
}
 0x327   : > { %s879_s17 = scalar_lea.hbm %s1119_s12, 16  ;;  %s883_s19 = scalar_lea.hbm %s1200_s7, 32 }
 0x328   : > { %p880_p10 = scmp.ne.s32.totalorder %s1119_s12, %s879_s17  ;;  %p884_p13 = scmp.lt.u32.totalorder %s1119_s12, %s1200_s7 }
 0x329   : > { %p885_p0 = scmp.lt.u32.totalorder %s883_s19, %s879_s17  ;;  %p887_p2 = scmp.lt.u32.totalorder %s879_s17, %s1119_s12 }
 0x32a   : > { %p881_p11 = pnand %p880_p10, %p1047_p5 }
 0x32b   : > { %p886_p1 = por %p885_p0, %p884_p13 }
 0x32c   : > { %p882_p12 = pneg %p881_p11 }
 0x32d   : > { %p888_p3 = por %p887_p2, %p886_p1 }
 0x32f   : > { %p889_p4 = pnand %p888_p3, %p882_p12 }
 0x331   : > { %892 = shalt.err (!%p889_p4)
}
 0x332   : > { %771 = dma.vmem_to_hbm [thread:$0]  (%p1047_p5), %s618_s14, 16, %s1119_s12, %s1094_s20   ;;  %v552_v37 = vlaneseq }
 0x333   : > { %s733_s23 = sshll.u32 %s1065_s16, 4  ;;  %s753_s15 = sshll.u32 %s1028_s27, 8 }
 0x334   : > { %v553_v38 = vshrl.u32 %v552_v37, 7  ;;  %s275_s22 = scalar_lea.vmem [#allocation2], %s733_s23  ;;  %s1148_s14 = scalar_lea.hbm %s1198_s5, %s753_s15 }
 0x335   : > { %s591_s30 = sshll.u32 %s275_s22, 4  ;;  %s569_s27 = scalar_lea.sflag [#allocation3], %s1065_s16  ;;  %s1150_s30 = int_to_ptr.vmem [resolvable:$true] %s591_s30 }
 0x336   : > { %v554_v39 = vsub.s32 0, %v553_v38  ;;  %s893_s17 = scalar_lea.vmem %s1150_s30, 256  ;;  %s966_s13 = smov [#allocation2]  }
 0x337   : > { %p894_p7 = scmp.ne.s32.totalorder %s1150_s30, %s893_s17  ;;  %s897_s18 = sshll.u32 %s966_s13, 4  ;;  %s898_s18 = int_to_ptr.vmem [resolvable:$false] %s897_s18 }
 0x338   : > { %s899_s19 = scalar_lea.vmem %s898_s18, 512  ;;  %p900_p10 = scmp.lt.s32.totalorder %s1150_s30, %s898_s18 }
 0x339   : > { %p895_p8 = pnand %p894_p7, %p1047_p5  ;;  %p901_p11 = scmp.lt.s32.totalorder %s899_s19, %s893_s17 }
 0x33b   : > { %p896_p9 = pneg %p895_p8  ;;  %p902_p12 = por %p901_p11, %p900_p10 }
 0x33d   : > { %p903_p13 = pnand %p902_p12, %p896_p9 }
 0x38a   : > { %v466_v36 = vpop.xlane.xlu1 %465 }
 0x38b   : > { %835 = vrcp.f32 %v466_v36 }
 0x38e   : > { %v562_v42 = vpop.permute.xlu1 %561 }
 0x395   : > { %v836_v40 = vpop.eup %835 }
 0x396   : > { %v555_v41 = vrot.slane %v836_v40, %v554_v39 }
 0x398   : > { %v556_v43 = vmul.f32 %v555_v41, %v1081_v32  ;;  %v557_v44 = vmul.f32 %v555_v41, %v1083_v33 }
 0x39a   : > { %v564_v45 = vadd.f32 %v562_v42, %v556_v43  ;;  %v565_v46 = vadd.f32 %v562_v42, %v557_v44 }
 0x39c   : > { %566 = vst [vmem:[%s275_s22] sm:$0xff] %v564_v45  ;;  %567 = vst [vmem:[%s275_s22 + $0x8] sm:$0xff] %v565_v46 }
 0x39d   : > { %906 = shalt.err (!%p903_p13)
}
 0x39e   : > { %s907_s16 = scalar_lea.hbm %s1148_s14, 256  ;;  %s911_s23 = scalar_lea.hbm %s1198_s5, 512 }
 0x39f   : > { %p908_p0 = scmp.ne.s32.totalorder %s1148_s14, %s907_s16  ;;  %p912_p3 = scmp.lt.u32.totalorder %s1148_s14, %s1198_s5 }
 0x3a0   : > { %p913_p4 = scmp.lt.u32.totalorder %s911_s23, %s907_s16  ;;  %p915_p8 = scmp.lt.u32.totalorder %s907_s16, %s1148_s14 }
 0x3a1   : > { %p909_p1 = pnand %p908_p0, %p1047_p5 }
 0x3a2   : > { %p914_p7 = por %p913_p4, %p912_p3 }
 0x3a3   : > { %p910_p2 = pneg %p909_p1 }
 0x3a4   : > { %p916_p9 = por %p915_p8, %p914_p7 }
 0x3a6   : > { %p917_p10 = pnand %p916_p9, %p910_p2 }
 0x3a8   : > { %920 = shalt.err (!%p917_p10)
}
 0x3a9   : > { %769 = dma.vmem_to_hbm [thread:$0]  (%p1047_p5), %s1150_s30, 256, %s1148_s14, %s569_s27  }
 0x3aa PF: > { %p785_p11 = scmp.ge.s32.totalorder %s959_s26, 2  ;;  %s629_s20 = sand.u32 1, %s947_s2  }
 0x3ab   : > { %s630_s12 = scalar_lea.sflag [#allocation3], %s629_s20 }
 0x3ac   : > { %p776_p12 = pnand %p785_p11, %p1051_p6 }
 0x3ae   : > { %938 = dma.done.wait (!%p776_p12), %s630_s12, 256  }
 0x3af   : > { %940 = vsyncadd (!%p776_p12), %s630_s12, 4294967040  ;;  %s638_s17 = sand.u32 1, %s729_s28  }
 0x3b0   : > { %s639_s13 = scalar_lea.sflag [#allocation5], %s638_s17 }
 0x3b1   : > { %942 = dma.done.wait (!%p776_p12), %s639_s13, 32  }
 0x3b2   : > { %944 = vsyncadd (!%p776_p12), %s639_s13, 4294967264  ;;  %p21_p5 = scmp.ge.s32.totalorder %s1032_s29, 4   ;;  %s1203_s2 = smov %s951_s24 }
 0x3b3   : > { %s1204_s24 = smov %s955_s25  ;;  %s1205_s25 = smov %s1045_s9 }
 0x3b4   : > { %s1206_s26 = smov %s1032_s29  ;;  %23 = sbr.rel (!%p21_p5) target bundleno = 5 (0x5), region = 107 }
 0x3bb   :  { %651 = vsyncpa [#allocation3], 1 }
 0x3bc   :  { %653 = vsyncpa [#allocation3 + $0x1], 1 }
 0x3bd   :  { %654 = vsyncpa [#allocation5], 1 }
 0x3be   :  { %656 = vsyncpa [#allocation5 + $0x1], 1 }

</bundles_post_ra>
